<compile_context>
chip_gen: v5e
topology: v5e:2x2
jax: 0.10.0
libtpu: 0.0.40
codegen_flags: <defaults>
</compile_context>

<pallas_src>
from typing import NamedTuple

import jax
import jax.numpy as jnp
from jax.experimental import pallas as pl
from jax.experimental.pallas import tpu as pltpu


def _round_up(x, m):
    return ((x + m - 1) // m) * m


def _prototype_kernel(x_ref, w_ref, b_ref, o_ref):
    # grid = (H tiles [parallel], D_in tiles [reduction, "arbitrary", last])
    # x_ref: (1, tk) f32   w_ref: (tk, tn)   b_ref: (1, tn) f32
    # o_ref: (1, tn) f32, resident across the K axis (same block index for all k)
    k = pl.program_id(1)

    @pl.when(k == 0)
    def _init():
        o_ref[...] = jnp.zeros_like(o_ref)

    # One MXU matvec per (tk, tn) W block; f32 accumulation.  x is cast to W's
    # dtype only here (after the f32 shot mean), so a bf16 W stream does not
    # perturb the mean itself.
    o_ref[...] += jnp.dot(
        x_ref[...].astype(w_ref.dtype), w_ref[...],
        preferred_element_type=jnp.float32)

    @pl.when(k == pl.num_programs(1) - 1)
    def _finalize():
        # Bias added once, after the K reduction (numerically identical).
        o_ref[...] += b_ref[...]


class PrototypeParams(NamedTuple):
    w: jax.Array   # (d_pad, h_pad) padded embedding weight (f32 or bf16)
    b: jax.Array   # (1, h_pad)     padded bias, f32
    d_in: int
    h: int
    tk: int
    tn: int


def prepare_prototype_params(weight, bias, *, tile_k=1024, tile_n=1024,
                             w_dtype=jnp.float32):
    """Pad the Linear-embedding parameters ONCE, outside the hot path.

    Args:
      weight: (D_in, H) embedding weight (x @ W layout)
      bias:   (H,)      embedding bias
      tile_k / tile_n: W tile sizes (multiples of 128).  Defaults (1024) keep
        double-buffered f32 W tiles at 8 MiB — safe on v7x's 64 MiB VMEM; on
        v5e/v6e (128 MiB VMEM) tiles up to 2048 can be swept.
      w_dtype: stream W in this dtype.  jnp.bfloat16 halves W HBM traffic
        (the kernel is HBM-bound on W); accumulation stays f32.
    """
    d_in, h = weight.shape
    tk = min(tile_k, _round_up(d_in, 128))
    h128 = _round_up(h, 128)
    tn = min(tile_n, h128)
    # v7x has 2 TensorCores: keep >= 2 H ("parallel") tiles whenever H allows
    # it so each core streams a disjoint half of W.
    if h128 > 128 and h128 // tn < 2:
        tn = _round_up(h128 // 2, 128)
    d_pad = _round_up(d_in, tk)
    h_pad = _round_up(h, tn)

    # Zero pad: zero x-columns / zero W-rows/cols contribute nothing.
    w = jnp.zeros((d_pad, h_pad), w_dtype).at[:d_in, :h].set(
        weight.astype(w_dtype))
    b = jnp.zeros((1, h_pad), jnp.float32).at[0, :h].set(
        bias.astype(jnp.float32))
    return PrototypeParams(w=w, b=b, d_in=d_in, h=h, tk=tk, tn=tn)


def task_binary_prototype(inputs, labels, params,
                          *, min_pallas_elements=1 << 20,
                          vmem_limit_bytes=48 * 1024 * 1024):
    """TaskBinaryPrototype forward: mean_n(Linear(inputs)) -> (H,) f32.

    Args:
      inputs: (N, D_in)  shots x features
      labels: (N,)       unused (forward-signature fidelity with the reference)
      params: PrototypeParams from prepare_prototype_params
    """
    del labels  # unused in the reference forward
    n, d_in = inputs.shape
    assert d_in == params.d_in
    d_pad, h_pad = params.w.shape
    tk, tn = params.tk, params.tn

    # Shot mean hoisted out of the kernel (exact reformulation):
    #   mean_n(x W + b) == (mean_n x) W + b
    x_mean = jnp.mean(inputs.astype(jnp.float32), axis=0, keepdims=True)
    if d_pad != d_in:
        x_mean = jnp.pad(x_mean, ((0, 0), (0, d_pad - d_in)))

    # Small-problem fallback: padding/launch/per-step overhead dominate; a
    # fused XLA GEMV is strictly faster below this threshold.
    if d_pad * h_pad < min_pallas_elements:
        out = jnp.dot(x_mean.astype(params.w.dtype), params.w,
                      preferred_element_type=jnp.float32) + params.b
        return out[0, :params.h]

    grid = (h_pad // tn, d_pad // tk)
    out = pl.pallas_call(
        _prototype_kernel,
        out_shape=jax.ShapeDtypeStruct((1, h_pad), jnp.float32),
        grid=grid,
        in_specs=[
            pl.BlockSpec((1, tk), lambda j, k: (0, k)),   # x mean slice (tiny)
            # W streamed in (tk, tn) blocks, default double-buffered pipeline.
            # If a trace shows exposed W DMA, add pipeline_mode=pl.Buffered(3).
            pl.BlockSpec((tk, tn), lambda j, k: (k, j)),
            pl.BlockSpec((1, tn), lambda j, k: (0, j)),   # bias tile
        ],
        out_specs=pl.BlockSpec((1, tn), lambda j, k: (0, j)),
        compiler_params=pltpu.CompilerParams(
            dimension_semantics=("parallel", "arbitrary"),
            # 48 MiB leaves headroom on v7x (64 MiB physical); raise to ~96 MiB
            # only for 2048-tile sweeps on v5e/v6e (128 MiB physical).
            vmem_limit_bytes=vmem_limit_bytes,
        ),
    )(x_mean, params.w, params.b)

    return out[0, :params.h]


def reference(inputs, labels, weight, bias):
    del labels
    rep = inputs @ weight + bias
    return jnp.sum(rep, axis=0) / float(rep.shape[0])


if __name__ == "__main__":
    key = jax.random.PRNGKey(0)
    k_in, k_lab, k_w, k_b = jax.random.split(key, 4)

    # Shots x features x embedding dim — small but big enough to exercise a
    # multi-tile grid in both axes.
    N, D_IN, H = 8, 256, 384

    inputs = jax.random.normal(k_in, (N, D_IN), dtype=jnp.float32)
    labels = jax.random.bernoulli(k_lab, 0.5, (N,)).astype(jnp.float32)
    # Deterministic in-script "embedding" parameters (nn.Linear(D_IN, H) analog).
    weight = jax.random.normal(k_w, (D_IN, H), dtype=jnp.float32) * 0.1
    bias = jax.random.normal(k_b, (H,), dtype=jnp.float32) * 0.1

    ref = reference(inputs, labels, weight, bias)

    # Case A: f32 W stream, small tiles -> grid (3, 2): exercises the parallel
    # H axis and the K-axis accumulation (init / finalize on different steps).
    params_f32 = prepare_prototype_params(weight, bias, tile_k=128, tile_n=128)
    out_f32 = task_binary_prototype(inputs, labels, params_f32,
                                    min_pallas_elements=0)
    jax.block_until_ready(out_f32)
    assert out_f32.shape == (H,)
    assert jnp.allclose(out_f32, ref, atol=1e-5, rtol=1e-5)

    # Case B: bf16 W stream (halves W HBM bytes), default (large) tiles,
    # f32 mean / bias / accumulator.
    params_bf16 = prepare_prototype_params(weight, bias,
                                           w_dtype=jnp.bfloat16)
    out_bf16 = task_binary_prototype(inputs, labels, params_bf16,
                                     min_pallas_elements=0)
    jax.block_until_ready(out_bf16)
    assert out_bf16.shape == (H,)
    assert jnp.allclose(out_bf16, ref, atol=1e-2, rtol=1e-2)

    # Case C: small-problem XLA fallback (default threshold: this W is tiny).
    out_fallback = task_binary_prototype(inputs, labels, params_f32)
    jax.block_until_ready(out_fallback)
    assert jnp.allclose(out_fallback, ref, atol=1e-5, rtol=1e-5)

    print("KERNEL_OK")
</pallas_src>

<mosaic_0001>
module attributes {stable_mosaic.version = 11 : i64} {
  func.func @_prototype_kernel(%arg0: i32, %arg1: i32, %arg2: memref<1x128xf32, #tpu.memory_space<vmem>>, %arg3: memref<128x128xf32, #tpu.memory_space<vmem>>, %arg4: memref<1x128xf32, #tpu.memory_space<vmem>>, %arg5: memref<1x128xf32, #tpu.memory_space<vmem>>) attributes {dimension_semantics = [#tpu.dimension_semantics<parallel>, #tpu.dimension_semantics<arbitrary>], iteration_bounds = array<i64: 3, 2>, scalar_prefetch = 0 : i64, scratch_operands = 0 : i64, tpu.core_type = #tpu.core_type<tc>, window_params = [{transform_indices = @transform_0, window_bounds = array<i64: 1, 128>}, {transform_indices = @transform_1, window_bounds = array<i64: 128, 128>}, {transform_indices = @transform_2, window_bounds = array<i64: 1, 128>}, {transform_indices = @transform_3, window_bounds = array<i64: 1, 128>}]} {
    %c0_i32 = arith.constant 0 : i32
    %0 = arith.cmpi eq, %arg1, %c0_i32 : i32
    %1 = arith.extui %0 : i1 to i32
    %c0_i32_0 = arith.constant 0 : i32
    %2 = arith.cmpi ne, %1, %c0_i32_0 : i32
    scf.if %2 {
      %cst_9 = arith.constant 0.000000e+00 : f32
      %12 = vector.broadcast %cst_9 : f32 to vector<1x128xf32>
      %c0_10 = arith.constant 0 : index
      %c0_11 = arith.constant 0 : index
      %13 = vector.load %arg5[%c0_10, %c0_11] : memref<1x128xf32, #tpu.memory_space<vmem>>, vector<1x128xf32>
      tpu.vector_store %arg5[%c0_10, %c0_11], %12 {strides = array<i32>} : memref<1x128xf32, #tpu.memory_space<vmem>>, vector<1x128xf32>,
    } else {
    }
    %c0 = arith.constant 0 : index
    %c0_1 = arith.constant 0 : index
    %3 = vector.load %arg5[%c0, %c0_1] : memref<1x128xf32, #tpu.memory_space<vmem>>, vector<1x128xf32>
    %c0_2 = arith.constant 0 : index
    %c0_3 = arith.constant 0 : index
    %4 = vector.load %arg2[%c0_2, %c0_3] : memref<1x128xf32, #tpu.memory_space<vmem>>, vector<1x128xf32>
    %c0_4 = arith.constant 0 : index
    %c0_5 = arith.constant 0 : index
    %5 = vector.load %arg3[%c0_4, %c0_5] : memref<128x128xf32, #tpu.memory_space<vmem>>, vector<128x128xf32>
    %cst = arith.constant dense<0.000000e+00> : vector<1x128xf32>
    %6 = tpu.matmul %4, %5, %cst {dimension_numbers = #tpu.dot_dimension_numbers<[1], [0], [0], [1], [0, 0, 1, 1], [], []>} : vector<1x128xf32>, vector<128x128xf32>, vector<1x128xf32> -> vector<1x128xf32>
    %7 = arith.addf %3, %6 : vector<1x128xf32>
    %c0_6 = arith.constant 0 : index
    %c0_7 = arith.constant 0 : index
    %8 = vector.load %arg5[%c0_6, %c0_7] : memref<1x128xf32, #tpu.memory_space<vmem>>, vector<1x128xf32>
    tpu.vector_store %arg5[%c0_6, %c0_7], %7 {strides = array<i32>} : memref<1x128xf32, #tpu.memory_space<vmem>>, vector<1x128xf32>,
    %c1_i32 = arith.constant 1 : i32
    %9 = arith.cmpi eq, %arg1, %c1_i32 : i32
    %10 = arith.extui %9 : i1 to i32
    %c0_i32_8 = arith.constant 0 : i32
    %11 = arith.cmpi ne, %10, %c0_i32_8 : i32
    scf.if %11 {
      %c0_9 = arith.constant 0 : index
      %c0_10 = arith.constant 0 : index
      %12 = vector.load %arg5[%c0_9, %c0_10] : memref<1x128xf32, #tpu.memory_space<vmem>>, vector<1x128xf32>
      %c0_11 = arith.constant 0 : index
      %c0_12 = arith.constant 0 : index
      %13 = vector.load %arg4[%c0_11, %c0_12] : memref<1x128xf32, #tpu.memory_space<vmem>>, vector<1x128xf32>
      %14 = arith.addf %12, %13 : vector<1x128xf32>
      %c0_13 = arith.constant 0 : index
      %c0_14 = arith.constant 0 : index
      %15 = vector.load %arg5[%c0_13, %c0_14] : memref<1x128xf32, #tpu.memory_space<vmem>>, vector<1x128xf32>
      tpu.vector_store %arg5[%c0_13, %c0_14], %14 {strides = array<i32>} : memref<1x128xf32, #tpu.memory_space<vmem>>, vector<1x128xf32>,
    } else {
    }
    return
  }
  func.func @transform_0(%arg0: i32, %arg1: i32) -> (i32, i32) {
    %c0_i32 = arith.constant 0 : i32
    %c0_i32_0 = arith.constant 0 : i32
    return %c0_i32, %arg1 : i32, i32
  }
  func.func @transform_1(%arg0: i32, %arg1: i32) -> (i32, i32) {
    %c0_i32 = arith.constant 0 : i32
    return %arg1, %arg0 : i32, i32
  }
  func.func @transform_2(%arg0: i32, %arg1: i32) -> (i32, i32) {
    %c0_i32 = arith.constant 0 : i32
    %c0_i32_0 = arith.constant 0 : i32
    return %c0_i32, %arg0 : i32, i32
  }
  func.func @transform_3(%arg0: i32, %arg1: i32) -> (i32, i32) {
    %c0_i32 = arith.constant 0 : i32
    %c0_i32_0 = arith.constant 0 : i32
    return %c0_i32, %arg0 : i32, i32
  }
}

</mosaic_0001>

<bundles_post_ra>
// kernel: tpu_custom_call.1
= control target key start
LH: loop header
LB: loop body
LE: loop exit
PB: predicated region body
PF: predicated region fallthrough
CT: control target
= control target key end

     0   :  { %s1198_s0 = inlined_call_operand.hbm [shape: f32[1,256], index: 0, kind: input, shape index: {}]   ;;  %s1199_s1 = inlined_call_operand.hbm [shape: f32[256,384], index: 1, kind: input, shape index: {}]   ;;  %s1200_s2 = inlined_call_operand.hbm [shape: f32[1,384], index: 2, kind: input, shape index: {}]   ;;  %s1201_s3 = inlined_call_operand.hbm [shape: f32[1,384], index: 3, kind: output, shape index: {}]  }
   0x1   :  { %1205 = sst [smem:[#allocation17_spill]] %s1198_s0 }
   0x2   :  { %1206 = sst [smem:[#allocation18_spill]] %s1199_s1 }
   0x3   :  { %1207 = sst [smem:[#allocation19_spill]] %s1201_s3 }
   0x4   :  { %8 = vsyncpa [#allocation3], 0 }
   0x5   :  { %10 = vsyncpa [#allocation3 + $0x1], 0 }
   0x6   :  { %11 = vsyncpa [#allocation6], 0 }
   0x7   :  { %13 = vsyncpa [#allocation6 + $0x1], 0 }
   0x8   :  { %14 = vsyncpa [#allocation4], 0 }
   0x9   :  { %16 = vsyncpa [#allocation4 + $0x1], 0  ;;  %s879_s12 = smov 0   ;;  %s881_s13 = smov 0  }
   0xa   :  { %s883_s14 = smov 0   ;;  %s885_s15 = smov 0  }
   0xb   :  { %s887_s16 = smov 0   ;;  %s889_s17 = smov 0  }
   0xc   :  { %s891_s18 = smov 0   ;;  %s893_s19 = smov 0  }
   0xd   :  { %s895_s20 = smov 0   ;;  %s897_s21 = smov 0  }
   0xe   :  { %s899_s22 = smov 0   ;;  %s901_s23 = smov 0  }
   0xf   :  { %s903_s24 = smov 0   ;;  %s905_s25 = smov 0  }
  0x10 LB: > { %1208 = sst [smem:[#allocation13_spill]] %s841_s22  ;;  %s34_s26 = sadd.s32 1, %s849_s24  ;;  %s853_s25 = sphi %s905_s25, %s22_s25   ;;  %s849_s24 = sphi %s903_s24, %s1241_s24   ;;  %s845_s23 = sphi %s901_s23, %s1240_s23   ;;  %s841_s22 = sphi %s899_s22, %s1239_s22   ;;  %s837_s21 = sphi %s897_s21, %s1238_s21   ;;  %s833_s20 = sphi %s895_s20, %s1237_s20   ;;  %s829_s19 = sphi %s893_s19, %s1236_s19   ;;  %s825_s18 = sphi %s891_s18, %s1235_s18   ;;  %s821_s17 = sphi %s889_s17, %s1234_s17   ;;  %s817_s16 = sphi %s887_s16, %s1233_s16   ;;  %s813_s15 = sphi %s885_s15, %s1232_s15   ;;  %s809_s14 = sphi %s883_s14, %s1231_s14   ;;  %s805_s13 = sphi %s881_s13, %s1230_s13   ;;  %s801_s12 = sphi %s879_s12, %s1229_s12  }
  0x11   : > { %p49_p0 = scmp.eq.s32.totalorder %s853_s25, 0  ;;  %p76_p1 = scmp.ne.s32.totalorder %s821_s17, %s817_s16 }
  0x12   : > { %p82_p2 = scmp.ne.s32.totalorder %s817_s16, %s813_s15  ;;  %p491_p4 = scmp.lt.s32.totalorder %s853_s25, 6 }
  0x13   : > { %p78_p3 = por %p76_p1, %p49_p0  ;;  %s175_s28 = sand.u32 1, %s853_s25  }
  0x14   : > { %s177_s29 = sand.u32 1, %s821_s17   ;;  %s468_s4 = smul.u32 48, %s845_s23 }
  0x15   : > { %s458_s30 = sshll.u32 %s177_s29, 7  ;;  %p481_p5 = pnand %p491_p4, %p78_p3 }
  0x16   : > { %s179_s5 = scalar_lea.vmem [#allocation5], %s458_s30  ;;  %s184_s7 = sadd.s32 %s849_s24, %s468_s4 }
  0x17   : > { %s189_s6 = sshll.u32 %s179_s5, 4  ;;  %s461_s8 = sshll.u32 %s184_s7, 3  ;;  %s190_s6 = int_to_ptr.vmem [resolvable:$true] %s189_s6 }
  0x18   : > { %s1209_s1 = sld [smem:[#allocation18_spill]]  ;;  %s968_s30 = scalar_lea.sflag [#allocation6], %s175_s28 }
  0x19   : > { %s855_s5 = smov 384   ;;  %s856_s4 = smov 128  }
  0x1a   : > { %s857_s7 = smov 8   ;;  %p462_p6 = scmp.ge.s32.totalorder %s853_s25, 1 }
  0x1b   : > { %p214_p7 = scmp.lt.s32.totalorder %s853_s25, 7  ;;  %s978_s9 = sadd.s32 4294967295, %s853_s25  }
  0x1c   : > { %s31_s28 = sadd.s32 1, %s845_s23  ;;  %s41_s10 = sadd.s32 1, %s833_s20 }
  0x1d   : > { %p973_p8 = pnand %p462_p6, %p214_p7  ;;  %p32_p9 = scmp.ge.s32.totalorder %s31_s28, 2 }
  0x1e   : > { %s186_s11 = scalar_lea.hbm %s1209_s1, %s461_s8  ;;  %p48_p10 = scmp.ne.s32.totalorder %s833_s20, %s829_s19 }
  0x1f   : > { %s187_s29 = sshll.u32 %s186_s11, 4  ;;  %p54_p11 = scmp.ne.s32.totalorder %s829_s19, %s825_s18  ;;  %s188_s29 = int_to_ptr.hbm [resolvable:$true] %s187_s29 }
  0x20   : > { %483 = dma.hbm_to_vmem [thread:$0]  (!%p481_p5), %s188_s29, 2048, %s190_s6, %s968_s30, %s855_s5, %s856_s4, %s857_s7  }
  0x21   : > { %p55_p12 = scmp.eq.s32.totalorder %s978_s9, 0  ;;  %s1243_s28 = smov (%p32_p9, %s31_s28), 0 }
  0x22   : > { %1211 = sst [smem:[#allocation14_spill]] %s1243_s28  ;;  %s1245_s26 = smov (!%p32_p9, %s34_s26), %s849_s24 }
  0x23   : > { %s38_s6 = ssub.s32 %s845_s23, %s1243_s28  ;;  %p996_p13 = por %p49_p0, %p48_p10 }
  0x24   : > { %p36_p1 = scmp.ge.s32.totalorder %s1245_s26, 3  ;;  %p39_p3 = scmp.eq.s32.totalorder %s38_s6, 0 }
  0x25   : > { %p1002_p5 = por %p55_p12, %p54_p11  ;;  %p1011_p6 = por %p82_p2, %p55_p12 }
  0x26   : > { %s1247_s26 = smov (%p36_p1, %s1245_s26), 0  ;;  %s158_s7 = sand.u32 1, %s833_s20  }
  0x27   : > { %1215 = sst [smem:[#allocation15_spill]] %s1247_s26  ;;  %s65_s4 = ssub.s32 %s849_s24, %s1247_s26 }
  0x28   : > { %s1018_s5 = scalar_select %p39_p3, %s833_s20, %s41_s10  }
  0x29   : > { %s66_s27 = sor.u32 %s65_s4, %s38_s6  ;;  %s1217_s0 = sld [smem:[#allocation17_spill]] }
  0x2a   : > { %1216 = sst [smem:[#allocation16_spill]] %s1018_s5  ;;  %p67_p7 = scmp.eq.s32.totalorder %s66_s27, 0 }
  0x2b   : > { %s161_s3 = scalar_lea.vmem [#allocation2], %s158_s7  ;;  %s1218_s10 = sadd.s32 1, %s821_s17 }
  0x2c   : > { %s168_s22 = sshll.u32 %s161_s3, 4  ;;  %p478_p2 = pnand %p491_p4, %p996_p13  ;;  %s169_s22 = int_to_ptr.vmem [resolvable:$true] %s168_s22 }
  0x2d   : > { %s1030_s26 = scalar_select %p67_p7, %s821_s17, %s1218_s10  }
  0x2e   : > { %s159_s27 = scalar_lea.sflag [#allocation3], %s158_s7  ;;  %s455_s1 = sadd.s32 4294967294, %s853_s25  }
  0x2f   : > { %s164_s28 = scalar_lea.hbm %s1217_s0, %s845_s23  ;;  %p93_p9 = scmp.eq.s32.totalorder %s65_s4, 0 }
  0x30   : > { %s166_s5 = sshll.u32 %s164_s28, 4  ;;  %s95_s6 = sadd.s32 1, %s809_s14  ;;  %s167_s5 = int_to_ptr.hbm [resolvable:$true] %s166_s5 }
  0x31   : > { %480 = dma.hbm_to_vmem [thread:$0]  (!%p478_p2), %s167_s5, 16, %s169_s22, %s159_s27  }
  0x32   : > { %p102_p10 = scmp.ne.s32.totalorder %s809_s14, %s805_s13  ;;  %p108_p11 = scmp.ne.s32.totalorder %s805_s13, %s801_s12 }
  0x33   : > { %s1043_s3 = scalar_select %p93_p9, %s809_s14, %s95_s6  }
  0x34   : > { %p1047_p1 = por %p102_p10, %p49_p0  ;;  %p1053_p3 = por %p108_p11, %p55_p12 }
  0x35   : > { %p132_p13 = scmp.eq.s32.totalorder %s978_s9, 5  ;;  %p138_p7 = scmp.eq.s32.totalorder %s455_s1, 5 }
  0x36   : > { %s201_s22 = sand.u32 1, %s809_s14   ;;  %s205_s7 = scalar_lea.hbm %s1200_s2, %s849_s24 }
  0x37   : > { %p1063_p2 = por %p132_p13, %p102_p10  ;;  %p1067_p0 = por %p138_p7, %p108_p11 }
  0x38   : > { %s207_s27 = sshll.u32 %s205_s7, 4  ;;  %s202_s6 = scalar_lea.vmem [#allocation7], %s201_s22  ;;  %s208_s27 = int_to_ptr.hbm [resolvable:$true] %s207_s27 }
  0x39   : > { %s209_s0 = sshll.u32 %s202_s6, 4  ;;  %p484_p12 = pnand %p491_p4, %p1047_p1  ;;  %s210_s0 = int_to_ptr.vmem [resolvable:$true] %s209_s0 }
  0x3a   : > { %218 = sbr.rel (%p973_p8) target bundleno = 272 (0x110), region = 32  ;;  %s220_s1 = sand.u32 (!%p973_p8), 1, %s829_s19  }
  0x3b   : > { %486 = dma.hbm_to_vmem [thread:$0]  (!%p484_p12), %s208_s27, 16, %s210_s0, %s968_s30  }
  0x3c   : > { %s221_s5 = scalar_lea.sflag (!%p973_p8), [#allocation3], %s220_s1  ;;  %s1079_s4 = scalar_lea.vmem (!%p973_p8), [#allocation2], %s220_s1 }
  0x3f   : > { %784 = dma.done.wait (%p1002_p5), %s221_s5, 16  }
  0x40   : > { %786 = vsyncadd (%p1002_p5), %s221_s5, 4294967280  ;;  %s229_s28 = sand.u32 1, %s978_s9   ;;  %s231_s22 = sand.u32 1, %s817_s16  }
  0x41   : > { %s463_s0 = sshll.u32 %s231_s22, 7  ;;  %s230_s30 = scalar_lea.sflag [#allocation6], %s229_s28 }
  0x42   : > { %s1087_s8 = scalar_lea.vmem [#allocation5], %s463_s0 }
  0x43   : > { %788 = dma.done.wait (%p1011_p6), %s230_s30, 2048  }
  0x44   : > { %790 = vsyncadd (%p1011_p6), %s230_s30, 4294965248  ;;  %s1094_s7 = sand.u32 1, %s805_s13  }
  0x45   : > { %s242_s18 = scalar_lea.vmem [#allocation7], %s1094_s7 }
  0x46   : > { %792 = dma.done.wait (%p1053_p3), %s230_s30, 16  }
  0x47   : > { %794 = vsyncadd (%p1053_p3), %s230_s30, 4294967280  ;;  %s1102_s9 = scalar_lea.vmem [#allocation8], %s1094_s7  ;;  %p464_p4 = scmp.ne.s32.totalorder %s837_s21, 0 }
  0x49   : > { %277 = sbr.rel (%p464_p4) target bundleno = 80 (0x50), region = 48 }
  0x4e   : > { %v858_v0 = vmov 0.0  }
  0x4f   : > { %278 = vst [vmem:[%s1102_s9] sm:$0x1] %v858_v0 }
  0x50 PF: > { %v296_v1 = vld [vmem:[%s1087_s8 + $0x78] sm:$0xff]  ;;  %v295_v2 = vld [vmem:[%s1087_s8 + $0x70] sm:$0xff]  ;;  %v294_v3 = vld [vmem:[%s1087_s8 + $0x68] sm:$0xff]  ;;  %p465_p8 = scmp.ne.s32.totalorder %s837_s21, 1 }
  0x51   : > { %297 = vmatpush.msra.mxu0 %v296_v1  ;;  %v293_v4 = vld [vmem:[%s1087_s8 + $0x60] sm:$0xff]  ;;  %v292_v5 = vld [vmem:[%s1087_s8 + $0x58] sm:$0xff]  ;;  %v291_v6 = vld [vmem:[%s1087_s8 + $0x50] sm:$0xff] }
  0x52   : > { %v290_v7 = vld [vmem:[%s1087_s8 + $0x48] sm:$0xff]  ;;  %v289_v8 = vld [vmem:[%s1087_s8 + $0x40] sm:$0xff]  ;;  %v288_v9 = vld [vmem:[%s1087_s8 + $0x38] sm:$0xff] }
  0x53   : > { %298 = vmatpush.msra.mxu0 %v295_v2  ;;  %v287_v10 = vld [vmem:[%s1087_s8 + $0x30] sm:$0xff]  ;;  %v286_v11 = vld [vmem:[%s1087_s8 + $0x28] sm:$0xff]  ;;  %v285_v12 = vld [vmem:[%s1087_s8 + $0x20] sm:$0xff] }
  0x54   : > { %v284_v13 = vld [vmem:[%s1087_s8 + $0x18] sm:$0xff]  ;;  %v283_v14 = vld [vmem:[%s1087_s8 + $0x10] sm:$0xff]  ;;  %v282_v15 = vld [vmem:[%s1087_s8 + $0x8] sm:$0xff] }
  0x55   : > { %299 = vmatpush.msra.mxu0 %v294_v3  ;;  %v281_v16 = vld [vmem:[%s1087_s8] sm:$0xff]  ;;  %v280_v17 = vld [vmem:[%s1079_s4] sm:$0x1] }
  0x56   : > { %v279_v18 = vld [vmem:[%s1102_s9] sm:$0x1] }
  0x57   : > { %300 = vmatpush.msra.mxu0 %v293_v4 }
  0x59   : > { %301 = vmatpush.msra.mxu0 %v292_v5 }
  0x5b   : > { %302 = vmatpush.msra.mxu0 %v291_v6 }
  0x5d   : > { %303 = vmatpush.msra.mxu0 %v290_v7 }
  0x5f   : > { %304 = vmatpush.msra.mxu0 %v289_v8 }
  0x61   : > { %305 = vmatpush.msra.mxu0 %v288_v9 }
  0x63   : > { %306 = vmatpush.msra.mxu0 %v287_v10 }
  0x65   : > { %307 = vmatpush.msra.mxu0 %v286_v11 }
  0x67   : > { %308 = vmatpush.msra.mxu0 %v285_v12 }
  0x69   : > { %309 = vmatpush.msra.mxu0 %v284_v13 }
  0x6b   : > { %310 = vmatpush.msra.mxu0 %v283_v14 }
  0x6d   : > { %311 = vmatpush.msra.mxu0 %v282_v15 }
  0x6f   : > { %312 = vmatpush.msra.mxu0 %v281_v16 }
  0x70   : > { %313 = vmatmul.f32.vlgmr.msra.gmra.mxu0 %v280_v17 }
  0xec   : > { %322 = sbr.rel (%p465_p8) target bundleno = 251 (0xfb), region = 52 }
  0xed   : > { %v314_v19 = vpop.f32.mrf.mxu0 }
  0xee   : > { %v317_v20 = vadd.f32 %v314_v19, %v279_v18 }
  0xf0   : > { %318 = vst [vmem:[%s1102_s9] sm:$0x1] %v317_v20 }
  0xf1   : > { %v324_v22 = vld [vmem:[%s242_s18] sm:$0x1] }
  0xf7   : > { %v323_v21 = vld [vmem:[%s1102_s9] sm:$0x1] }
  0xf8   : > { %v325_v23 = vadd.f32 %v324_v22, %v323_v21 }
  0xfa   : > { %326 = vst [vmem:[%s1102_s9] sm:$0x1] %v325_v23 }
  0xfb PF: > { %s1223_s29 = sld [smem:[#allocation13_spill]]  ;;  %s338_s5 = sshll.u32 %s1102_s9, 4  ;;  %s339_s5 = int_to_ptr.vmem [resolvable:$true] %s338_s5 }
  0xfc   : > { %s1224_s6 = sld [smem:[#allocation19_spill]]  ;;  %s328_s4 = scalar_lea.sflag [#allocation4], %s1094_s7 }
 0x102   : > { %s336_s1 = scalar_lea.hbm %s1224_s6, %s1223_s29  ;;  %s719_s8 = scalar_lea.hbm %s1224_s6, 3 }
 0x103   : > { %s340_s21 = sshll.u32 %s336_s1, 4  ;;  %s341_s21 = int_to_ptr.hbm [resolvable:$true] %s340_s21 }
 0x104   : > { %s713_s28 = sshra.s32 %s341_s21, 4  ;;  %s714_s28 = int_to_ptr.hbm [resolvable:$true] %s713_s28 }
 0x105   : > { %s715_s22 = scalar_lea.hbm %s714_s28, 1  ;;  %p720_p10 = scmp.lt.s32.totalorder %s714_s28, %s1224_s6 }
 0x106   : > { %p716_p5 = scmp.ne.s32.totalorder %s714_s28, %s715_s22  ;;  %p721_p11 = scmp.lt.s32.totalorder %s719_s8, %s715_s22 }
 0x108   : > { %p717_p6 = pnand %p716_p5, %p1063_p2  ;;  %p722_p1 = por %p721_p11, %p720_p10 }
 0x10a   : > { %p718_p9 = pneg %p717_p6 }
 0x10c   : > { %p723_p3 = pnand %p722_p1, %p718_p9 }
 0x10e   : > { %726 = shalt.err (!%p723_p3)
}
 0x10f   : > { %475 = dma.vmem_to_hbm [thread:$0]  (%p1063_p2), %s339_s5, 16, %s341_s21, %s328_s4  }
 0x110 PF: > { %p492_p13 = scmp.ge.s32.totalorder %s853_s25, 2  ;;  %s352_s7 = sand.u32 1, %s801_s12  }
 0x111   : > { %s353_s9 = scalar_lea.sflag [#allocation4], %s352_s7 }
 0x112   : > { %p488_p7 = pnand %p492_p13, %p1067_p0 }
 0x114   : > { %p489_p12 = pneg %p488_p7 }
 0x116   : > { %796 = dma.done.wait (%p489_p12), %s353_s9, 16  }
 0x117   : > { %798 = vsyncadd (%p489_p12), %s353_s9, 4294967280  ;;  %s22_s25 = sadd.s32 1, %s853_s25   ;;  %s1226_s10 = sld [smem:[#allocation16_spill]] }
 0x118   : > { %p1151_p4 = scmp.ge.s32.totalorder %s22_s25, 8   ;;  %s1227_s27 = sld [smem:[#allocation14_spill]] }
 0x119   : > { %s1228_s1 = sld [smem:[#allocation15_spill]]  ;;  %s1229_s12 = smov %s805_s13 }
 0x11a   : > { %s1230_s13 = smov %s809_s14  ;;  %s1231_s14 = smov %s1043_s3 }
 0x11b   : > { %s1232_s15 = smov %s817_s16  ;;  %s1233_s16 = smov %s821_s17 }
 0x11c   : > { %s1234_s17 = smov %s1030_s26  ;;  %s1235_s18 = smov %s829_s19 }
 0x11d   : > { %s1236_s19 = smov %s833_s20  ;;  %s1237_s20 = smov %s1226_s10 }
 0x11e   : > { %s1238_s21 = smov %s845_s23  ;;  %s1239_s22 = smov %s849_s24 }
 0x11f   : > { %s1240_s23 = smov %s1227_s27  ;;  %s1241_s24 = smov %s1228_s1 }
 0x120   :  { %21 = sbr.rel (!%p1151_p4) target bundleno = 16 (0x10), region = 109 }
 0x125   :  { %358 = vsyncpa [#allocation3], 1 }
 0x126   :  { %360 = vsyncpa [#allocation3 + $0x1], 1 }
 0x127   :  { %361 = vsyncpa [#allocation6], 1 }
 0x128   :  { %363 = vsyncpa [#allocation6 + $0x1], 1 }
 0x129   :  { %364 = vsyncpa [#allocation4], 1 }
 0x12a   :  { %366 = vsyncpa [#allocation4 + $0x1], 1 }

</bundles_post_ra>
